<compile_context>
chip_gen: v6e
topology: v6e:2x2x1
jax: 0.10.0
libtpu: 0.0.40
codegen_flags: <defaults>
</compile_context>

<pallas_src>
import jax
import jax.numpy as jnp
from jax.experimental import pallas as pl
from jax.experimental.pallas import tpu as pltpu

BN_EPS = 1e-3


def _se_conv_bn_kernel(s_ref, w1_ref, b1_ref, x_ref, w2_ref, gamma_ref, beta_ref,
                       o_ref, y_ref):
    # ---- Grid-invariant SE gate: compute once (first tile), keep in VMEM. ----
    @pl.when(pl.program_id(0) == 0)
    def _():
        # conv2d181 (1x1 on a 1x1 spatial input): [1, C_se] @ [C_se, C_mid] + b.
        # Fully f32 (inputs are tiny) so the sigmoid gate has no bf16 rounding.
        logits = jnp.dot(s_ref[...], w1_ref[...],
                         preferred_element_type=jnp.float32) + b1_ref[...]
        se = jax.nn.sigmoid(logits)                               # [1, C_mid]
        # operator.mul: per-channel gate broadcast over the HW sublanes.
        # bf16 scratch feeds the MXU and halves the resident size.
        y_ref[...] = (se * x_ref[...]).astype(jnp.bfloat16)       # [HW, C_mid]

    # conv2d182 (1x1, no bias): [HW, C_mid] @ [C_mid, tile_cout], f32 accumulate.
    out = jnp.dot(y_ref[...], w2_ref[...], preferred_element_type=jnp.float32)

    # batchnorm2d108 (training mode, N=1): biased batch stats over HW in a
    # single pass (sum + sum of squares), all f32.
    inv_hw = 1.0 / out.shape[0]
    mean = jnp.sum(out, axis=0, keepdims=True) * inv_hw           # [1, Ct]
    ex2 = jnp.sum(out * out, axis=0, keepdims=True) * inv_hw      # [1, Ct]
    var = jnp.maximum(ex2 - mean * mean, 0.0)                     # guard cancellation
    scale = jax.lax.rsqrt(var + BN_EPS) * gamma_ref[...]
    o_ref[...] = ((out - mean) * scale + beta_ref[...]).astype(o_ref.dtype)


def prepare_params(w1, b1, w2, gamma, beta):
    """One-time parameter layout/cast (run at init time, not per forward)."""
    C_mid, C_se = w1.shape[0], w1.shape[1]
    C_out = w2.shape[0]
    return {
        "w1t": w1.reshape(C_mid, C_se).T.astype(jnp.float32),     # [C_se, C_mid] f32
        "b1": b1.reshape(1, C_mid).astype(jnp.float32),           # [1, C_mid]
        "w2t": w2.reshape(C_out, C_mid).T.astype(jnp.bfloat16),   # [C_mid, C_out] bf16
        "gamma": gamma.reshape(1, C_out).astype(jnp.float32),     # [1, C_out]
        "beta": beta.reshape(1, C_out).astype(jnp.float32),       # [1, C_out]
    }


def se_conv_bn_hwc(s_row, x_hwc, params, *, tile_cout=None):
    """Fast path.  s_row: [1, C_se] f32; x_hwc: [HW, C_mid] (channels on lanes).

    Returns [HW, C_out] f32 (lane-dense).  Default is a single grid step
    (tile_cout = C_out), which is best on single-TensorCore v5e/v6e; pass
    tile_cout=256 to benchmark a 2-tile split on v7x.
    """
    HW, C_mid = x_hwc.shape
    C_se = s_row.shape[1]
    C_out = params["w2t"].shape[1]
    if tile_cout is None:
        tile_cout = C_out                       # grid=(1,) — no duplicated SE work
    assert C_out % tile_cout == 0
    n_tiles = C_out // tile_cout

    return pl.pallas_call(
        _se_conv_bn_kernel,
        out_shape=jax.ShapeDtypeStruct((HW, C_out), jnp.float32),
        grid_spec=pltpu.PrefetchScalarGridSpec(
            num_scalar_prefetch=0,
            grid=(n_tiles,),
            in_specs=[
                pl.BlockSpec((1, C_se), lambda j: (0, 0)),            # squeezed input
                pl.BlockSpec((C_se, C_mid), lambda j: (0, 0)),        # conv2d181 W^T (f32)
                pl.BlockSpec((1, C_mid), lambda j: (0, 0)),           # conv2d181 bias
                pl.BlockSpec((HW, C_mid), lambda j: (0, 0)),          # main activation (bf16)
                pl.BlockSpec((C_mid, tile_cout), lambda j: (0, j)),   # conv2d182 W^T tile (bf16)
                pl.BlockSpec((1, tile_cout), lambda j: (0, j)),       # BN gamma tile
                pl.BlockSpec((1, tile_cout), lambda j: (0, j)),       # BN beta tile
            ],
            out_specs=pl.BlockSpec((HW, tile_cout), lambda j: (0, j)),
            scratch_shapes=[pltpu.VMEM((HW, C_mid), jnp.bfloat16)],   # persistent SE gate
        ),
        compiler_params=pltpu.CompilerParams(
            # "arbitrary": the gated activation is written at j == 0 and reused
            # by later C_out tiles, so the axis must run in order on one core.
            dimension_semantics=("arbitrary",)),
    )(s_row, params["w1t"], params["b1"], x_hwc, params["w2t"],
      params["gamma"], params["beta"])


def se_conv_bn(x_se, x_main, w1, b1, w2, gamma, beta, *, tile_cout=None):
    """Module-compatible NCHW wrapper (x_se: [1,C_se,1,1], x_main: [1,C_mid,H,W]).

    The activation transpose here is layout plumbing only; in a full network the
    producer would emit NHWC/[HW, C] directly and call se_conv_bn_hwc.
    """
    N, C_mid, H, W = x_main.shape
    assert N == 1, "module is used with batch size 1"
    params = prepare_params(w1, b1, w2, gamma, beta)          # one-time in real use
    s_row = x_se.reshape(1, -1).astype(jnp.float32)
    x_hwc = x_main.reshape(C_mid, H * W).T.astype(jnp.bfloat16)
    out = se_conv_bn_hwc(s_row, x_hwc, params, tile_cout=tile_cout)   # [HW, C_out]
    # TODO(synk): drop this trailing transpose by keeping the consumer in NHWC.
    return out.T.reshape(1, -1, H, W)


def _reference(x_se, x_main, w1, b1, w2, gamma, beta):
    """Plain-JAX f32 reference (same semantics, NCHW)."""
    C_mid, C_se = w1.shape[0], w1.shape[1]
    C_out = w2.shape[0]
    se = jnp.einsum("oi,nihw->nohw", w1.reshape(C_mid, C_se), x_se,
                    precision="highest") + b1.reshape(1, -1, 1, 1)
    se = jax.nn.sigmoid(se)
    y = se * x_main
    out = jnp.einsum("oi,nihw->nohw", w2.reshape(C_out, C_mid), y,
                     precision="highest")
    mean = out.mean(axis=(0, 2, 3), keepdims=True)
    var = ((out - mean) ** 2).mean(axis=(0, 2, 3), keepdims=True)
    return (out - mean) / jnp.sqrt(var + BN_EPS) * gamma.reshape(1, -1, 1, 1) \
        + beta.reshape(1, -1, 1, 1)


if __name__ == "__main__":
    # Small shapes consistent with the module (orig: C_se=76, C_mid=1824,
    # C_out=512, H=W=7).  These exercise the real padding regimes: HW=49 is not
    # a multiple of 8 and C_se/C_mid are not multiples of 128.
    N, C_se, C_mid, C_out, H, W = 1, 12, 192, 256, 7, 7

    key = jax.random.PRNGKey(0)
    k0, k1, k2, k3, k4, k5, k6 = jax.random.split(key, 7)

    x567 = jax.random.normal(k0, (N, C_se, 1, 1), jnp.float32)    # squeezed input
    x564 = jax.random.normal(k1, (N, C_mid, H, W), jnp.float32)   # main activation

    # Deterministic synthetic parameters (shapes follow the module __init__).
    w1 = 0.05 * jax.random.normal(k2, (C_mid, C_se, 1, 1), jnp.float32)   # conv2d181.weight
    b1 = 0.05 * jax.random.normal(k3, (C_mid,), jnp.float32)              # conv2d181.bias
    w2 = 0.05 * jax.random.normal(k4, (C_out, C_mid, 1, 1), jnp.float32)  # conv2d182.weight
    gamma = 1.0 + 0.1 * jax.random.normal(k5, (C_out,), jnp.float32)      # bn.weight
    beta = 0.1 * jax.random.normal(k6, (C_out,), jnp.float32)             # bn.bias

    ref = _reference(x567, x564, w1, b1, w2, gamma, beta)

    # Default: single grid step (best on 1-TC v5e/v6e; also a fine v7x default).
    out = jax.block_until_ready(se_conv_bn(x567, x564, w1, b1, w2, gamma, beta))
    assert out.shape == (N, C_out, H, W)
    # bf16 storage of x / w2 with f32 accumulation -> slightly loose tolerance.
    assert jnp.allclose(out, ref, atol=2e-2, rtol=2e-2), \
        f"max abs err {jnp.max(jnp.abs(out - ref))}"

    # Multi-tile path (exercises the hoisted, grid-invariant SE gate; the option
    # one would benchmark on v7x's two TensorCores).
    out2 = jax.block_until_ready(
        se_conv_bn(x567, x564, w1, b1, w2, gamma, beta, tile_cout=128))
    assert jnp.allclose(out2, ref, atol=2e-2, rtol=2e-2), \
        f"max abs err {jnp.max(jnp.abs(out2 - ref))}"

    print("KERNEL_OK")
</pallas_src>

<mosaic_0001>
module attributes {stable_mosaic.version = 11 : i64} {
  func.func @_se_conv_bn_kernel(%arg0: i32, %arg1: memref<1x12xf32, #tpu.memory_space<vmem>>, %arg2: memref<12x192xf32, #tpu.memory_space<vmem>>, %arg3: memref<1x192xf32, #tpu.memory_space<vmem>>, %arg4: memref<49x192xbf16, #tpu.memory_space<vmem>>, %arg5: memref<192x256xbf16, #tpu.memory_space<vmem>>, %arg6: memref<1x256xf32, #tpu.memory_space<vmem>>, %arg7: memref<1x256xf32, #tpu.memory_space<vmem>>, %arg8: memref<49x256xf32, #tpu.memory_space<vmem>>, %arg9: memref<49x192xbf16, #tpu.memory_space<vmem>>) attributes {dimension_semantics = [#tpu.dimension_semantics<arbitrary>], iteration_bounds = array<i64: 1>, scalar_prefetch = 0 : i64, scratch_operands = 1 : i64, tpu.core_type = #tpu.core_type<tc>, window_params = [{pipeline_mode = #tpu.pipeline_mode<synchronous>, transform_indices = @transform_0, window_bounds = array<i64: 1, 12>}, {pipeline_mode = #tpu.pipeline_mode<synchronous>, transform_indices = @transform_1, window_bounds = array<i64: 12, 192>}, {pipeline_mode = #tpu.pipeline_mode<synchronous>, transform_indices = @transform_2, window_bounds = array<i64: 1, 192>}, {pipeline_mode = #tpu.pipeline_mode<synchronous>, transform_indices = @transform_3, window_bounds = array<i64: 49, 192>}, {transform_indices = @transform_4, window_bounds = array<i64: 192, 256>}, {transform_indices = @transform_5, window_bounds = array<i64: 1, 256>}, {transform_indices = @transform_6, window_bounds = array<i64: 1, 256>}, {transform_indices = @transform_7, window_bounds = array<i64: 49, 256>}]} {
    %c0_i32 = arith.constant 0 : i32
    %0 = arith.cmpi eq, %arg0, %c0_i32 : i32
    %1 = arith.extui %0 : i1 to i32
    %c0_i32_0 = arith.constant 0 : i32
    %2 = arith.cmpi ne, %1, %c0_i32_0 : i32
    scf.if %2 {
      %c0_16 = arith.constant 0 : index
      %c0_17 = arith.constant 0 : index
      %32 = vector.load %arg1[%c0_16, %c0_17] : memref<1x12xf32, #tpu.memory_space<vmem>>, vector<1x12xf32>
      %c0_18 = arith.constant 0 : index
      %c0_19 = arith.constant 0 : index
      %33 = vector.load %arg2[%c0_18, %c0_19] : memref<12x192xf32, #tpu.memory_space<vmem>>, vector<12x192xf32>
      %cst_20 = arith.constant dense<0.000000e+00> : vector<1x192xf32>
      %34 = tpu.matmul %32, %33, %cst_20 {dimension_numbers = #tpu.dot_dimension_numbers<[1], [0], [0], [1], [0, 0, 1, 1], [], []>} : vector<1x12xf32>, vector<12x192xf32>, vector<1x192xf32> -> vector<1x192xf32>
      %c0_21 = arith.constant 0 : index
      %c0_22 = arith.constant 0 : index
      %35 = vector.load %arg3[%c0_21, %c0_22] : memref<1x192xf32, #tpu.memory_space<vmem>>, vector<1x192xf32>
      %36 = arith.addf %34, %35 : vector<1x192xf32>
      %37 = arith.negf %36 : vector<1x192xf32>
      %38 = math.exp %37 : vector<1x192xf32>
      %cst_23 = arith.constant 1.000000e+00 : f32
      %39 = vector.broadcast %cst_23 : f32 to vector<1x192xf32>
      %40 = arith.addf %39, %38 : vector<1x192xf32>
      %41 = arith.divf %39, %40 : vector<1x192xf32>
      %c0_24 = arith.constant 0 : index
      %c0_25 = arith.constant 0 : index
      %42 = vector.load %arg4[%c0_24, %c0_25] : memref<49x192xbf16, #tpu.memory_space<vmem>>, vector<49x192xbf16>
      %43 = arith.extf %42 : vector<49x192xbf16> to vector<49x192xf32>
      %44 = vector.broadcast %41 : vector<1x192xf32> to vector<49x192xf32>
      %45 = arith.mulf %44, %43 : vector<49x192xf32>
      %46 = arith.truncf %45 : vector<49x192xf32> to vector<49x192xbf16>
      %c0_26 = arith.constant 0 : index
      %c0_27 = arith.constant 0 : index
      %47 = vector.load %arg9[%c0_26, %c0_27] : memref<49x192xbf16, #tpu.memory_space<vmem>>, vector<49x192xbf16>
      tpu.vector_store %arg9[%c0_26, %c0_27], %46 {strides = array<i32>} : memref<49x192xbf16, #tpu.memory_space<vmem>>, vector<49x192xbf16>,
    } else {
    }
    %c0 = arith.constant 0 : index
    %c0_1 = arith.constant 0 : index
    %3 = vector.load %arg9[%c0, %c0_1] : memref<49x192xbf16, #tpu.memory_space<vmem>>, vector<49x192xbf16>
    %c0_2 = arith.constant 0 : index
    %c0_3 = arith.constant 0 : index
    %4 = vector.load %arg5[%c0_2, %c0_3] : memref<192x256xbf16, #tpu.memory_space<vmem>>, vector<192x256xbf16>
    %cst = arith.constant dense<0.000000e+00> : vector<49x256xf32>
    %5 = tpu.matmul %3, %4, %cst {dimension_numbers = #tpu.dot_dimension_numbers<[1], [0], [0], [1], [0, 0, 1, 1], [], []>} : vector<49x192xbf16>, vector<192x256xbf16>, vector<49x256xf32> -> vector<49x256xf32>
    %cst_4 = arith.constant dense<0.000000e+00> : vector<256xf32>
    %6 = vector.multi_reduction <add>, %5, %cst_4 [0] : vector<49x256xf32> to vector<256xf32>
    %7 = vector.shape_cast %6 : vector<256xf32> to vector<1x256xf32>
    %cst_5 = arith.constant 0.0204081628 : f32
    %8 = vector.broadcast %cst_5 : f32 to vector<1x256xf32>
    %9 = arith.mulf %7, %8 : vector<1x256xf32>
    %10 = arith.mulf %5, %5 : vector<49x256xf32>
    %cst_6 = arith.constant dense<0.000000e+00> : vector<256xf32>
    %11 = vector.multi_reduction <add>, %10, %cst_6 [0] : vector<49x256xf32> to vector<256xf32>
    %12 = vector.shape_cast %11 : vector<256xf32> to vector<1x256xf32>
    %cst_7 = arith.constant 0.0204081628 : f32
    %13 = vector.broadcast %cst_7 : f32 to vector<1x256xf32>
    %14 = arith.mulf %12, %13 : vector<1x256xf32>
    %15 = arith.mulf %9, %9 : vector<1x256xf32>
    %16 = arith.subf %14, %15 : vector<1x256xf32>
    %cst_8 = arith.constant 0.000000e+00 : f32
    %17 = vector.broadcast %cst_8 : f32 to vector<1x256xf32>
    %18 = arith.maximumf %16, %17 : vector<1x256xf32>
    %cst_9 = arith.constant 1.000000e-03 : f32
    %19 = vector.broadcast %cst_9 : f32 to vector<1x256xf32>
    %20 = arith.addf %18, %19 : vector<1x256xf32>
    %21 = math.rsqrt %20 : vector<1x256xf32>
    %c0_10 = arith.constant 0 : index
    %c0_11 = arith.constant 0 : index
    %22 = vector.load %arg6[%c0_10, %c0_11] : memref<1x256xf32, #tpu.memory_space<vmem>>, vector<1x256xf32>
    %23 = arith.mulf %21, %22 : vector<1x256xf32>
    %24 = vector.broadcast %9 : vector<1x256xf32> to vector<49x256xf32>
    %25 = arith.subf %5, %24 : vector<49x256xf32>
    %26 = vector.broadcast %23 : vector<1x256xf32> to vector<49x256xf32>
    %27 = arith.mulf %25, %26 : vector<49x256xf32>
    %c0_12 = arith.constant 0 : index
    %c0_13 = arith.constant 0 : index
    %28 = vector.load %arg7[%c0_12, %c0_13] : memref<1x256xf32, #tpu.memory_space<vmem>>, vector<1x256xf32>
    %29 = vector.broadcast %28 : vector<1x256xf32> to vector<49x256xf32>
    %30 = arith.addf %27, %29 : vector<49x256xf32>
    %c0_14 = arith.constant 0 : index
    %c0_15 = arith.constant 0 : index
    %31 = vector.load %arg8[%c0_14, %c0_15] : memref<49x256xf32, #tpu.memory_space<vmem>>, vector<49x256xf32>
    tpu.vector_store %arg8[%c0_14, %c0_15], %30 {strides = array<i32>} : memref<49x256xf32, #tpu.memory_space<vmem>>, vector<49x256xf32>,
    return
  }
  func.func @transform_0(%arg0: i32) -> (i32, i32) {
    %c0_i32 = arith.constant 0 : i32
    %c0_i32_0 = arith.constant 0 : i32
    %c0_i32_1 = arith.constant 0 : i32
    return %c0_i32, %c0_i32_0 : i32, i32
  }
  func.func @transform_1(%arg0: i32) -> (i32, i32) {
    %c0_i32 = arith.constant 0 : i32
    %c0_i32_0 = arith.constant 0 : i32
    %c0_i32_1 = arith.constant 0 : i32
    return %c0_i32, %c0_i32_0 : i32, i32
  }
  func.func @transform_2(%arg0: i32) -> (i32, i32) {
    %c0_i32 = arith.constant 0 : i32
    %c0_i32_0 = arith.constant 0 : i32
    %c0_i32_1 = arith.constant 0 : i32
    return %c0_i32, %c0_i32_0 : i32, i32
  }
  func.func @transform_3(%arg0: i32) -> (i32, i32) {
    %c0_i32 = arith.constant 0 : i32
    %c0_i32_0 = arith.constant 0 : i32
    %c0_i32_1 = arith.constant 0 : i32
    return %c0_i32, %c0_i32_0 : i32, i32
  }
  func.func @transform_4(%arg0: i32) -> (i32, i32) {
    %c0_i32 = arith.constant 0 : i32
    %c0_i32_0 = arith.constant 0 : i32
    return %c0_i32, %arg0 : i32, i32
  }
  func.func @transform_5(%arg0: i32) -> (i32, i32) {
    %c0_i32 = arith.constant 0 : i32
    %c0_i32_0 = arith.constant 0 : i32
    return %c0_i32, %arg0 : i32, i32
  }
  func.func @transform_6(%arg0: i32) -> (i32, i32) {
    %c0_i32 = arith.constant 0 : i32
    %c0_i32_0 = arith.constant 0 : i32
    return %c0_i32, %arg0 : i32, i32
  }
  func.func @transform_7(%arg0: i32) -> (i32, i32) {
    %c0_i32 = arith.constant 0 : i32
    %c0_i32_0 = arith.constant 0 : i32
    return %c0_i32, %arg0 : i32, i32
  }
}

</mosaic_0001>

<bundles_post_ra>
// kernel: tpu_custom_call.1
= control target key start
LH: loop header
LB: loop body
LE: loop exit
PB: predicated region body
PF: predicated region fallthrough
CT: control target
= control target key end

     0   :  { %12 = vsyncpa [#allocation4], 0  ;;  %s1244_s0 = inlined_call_operand.hbm [shape: f32[1,12], index: 0, kind: input, shape index: {}]   ;;  %s1245_s1 = inlined_call_operand.hbm [shape: f32[12,192], index: 1, kind: input, shape index: {}]   ;;  %s1246_s2 = inlined_call_operand.vmem [shape: f32[1,192], index: 2, kind: input, shape index: {}]   ;;  %s1247_s3 = inlined_call_operand.hbm [shape: bf16[49,192], index: 3, kind: input, shape index: {}]   ;;  %s1248_s4 = inlined_call_operand.hbm [shape: bf16[192,256], index: 4, kind: input, shape index: {}]   ;;  %s1249_s5 = inlined_call_operand.vmem [shape: f32[1,256], index: 5, kind: input, shape index: {}]   ;;  %s1250_s6 = inlined_call_operand.vmem [shape: f32[1,256], index: 6, kind: input, shape index: {}]   ;;  %s1251_s7 = inlined_call_operand.hbm [shape: f32[49,256], index: 7, kind: output, shape index: {}]  }
   0x1   :  { %13 = vsyncpa [#allocation7], 0 }
   0x2   :  { %14 = vsyncpa [#allocation10], 0 }
   0x3   :  { %15 = vsyncpa [#allocation5], 0  ;;  %s1014_s24 = smov [#allocation6]  }
   0x4   :  { %s31_s25 = sshll.u32 %s1014_s24, 4  ;;  %s32_s25 = int_to_ptr.vmem [resolvable:$true] %s31_s25 }
   0x5   :  { %s914_s26 = scalar_lea.vmem %s32_s25, 512  ;;  %p919_p1 = scmp.lt.s32.totalorder %s32_s25, %s32_s25 }
   0x6   :  { %p915_p0 = scmp.ne.s32.totalorder %s32_s25, %s914_s26  ;;  %p920_p2 = scmp.lt.s32.totalorder %s914_s26, %s914_s26 }
   0x8   :  { %p921_p3 = por %p920_p2, %p919_p1 }
   0xa   :  { %p922_p4 = pnand %p921_p3, %p915_p0 }
   0xc   :  { %925 = shalt.err (!%p922_p4)
}
   0xd   :  { %s1015_s27 = smov 256   ;;  %s1016_s28 = smov 16  }
   0xe   :  { %37 = dma.hbm_to_vmem [thread:$0]  %s1245_s1, 512, %s32_s25, [#allocation7], %s1015_s27, %s1015_s27, %s1016_s28  }
   0xf   :  { %s1017_s8 = smov [#allocation3]   ;;  %s1018_s10 = smov [#allocation8]  }
  0x10   :  { %s22_s9 = sshll.u32 %s1017_s8, 4  ;;  %s45_s11 = sshll.u32 %s1018_s10, 4  ;;  %s23_s9 = int_to_ptr.vmem [resolvable:$true] %s22_s9  ;;  %s46_s11 = int_to_ptr.vmem [resolvable:$true] %s45_s11 }
  0x11   :  { %s934_s12 = scalar_lea.vmem %s23_s9, 16  ;;  %s938_s13 = scalar_lea.vmem %s23_s9, 32 }
  0x12   :  { %p935_p5 = scmp.ne.s32.totalorder %s23_s9, %s934_s12  ;;  %p939_p6 = scmp.lt.s32.totalorder %s23_s9, %s23_s9 }
  0x13   :  { %p940_p7 = scmp.lt.s32.totalorder %s938_s13, %s934_s12 }
  0x15   :  { %p941_p8 = por %p940_p7, %p939_p6 }
  0x17   :  { %p942_p9 = pnand %p941_p8, %p935_p5 }
  0x19   :  { %945 = shalt.err (!%p942_p9)
}
  0x1a   :  { %25 = dma.hbm_to_vmem [thread:$0]  %s1244_s0, 16, %s23_s9, [#allocation4]  }
  0x1b   :  { %s954_s16 = scalar_lea.vmem %s46_s11, 896  ;;  %p959_p11 = scmp.lt.s32.totalorder %s46_s11, %s46_s11 }
  0x1c   :  { %p955_p10 = scmp.ne.s32.totalorder %s46_s11, %s954_s16  ;;  %p960_p12 = scmp.lt.s32.totalorder %s954_s16, %s954_s16 }
  0x1e   :  { %p961_p13 = por %p960_p12, %p959_p11 }
  0x20   :  { %p962_p0 = pnand %p961_p13, %p955_p10 }
  0x22   :  { %965 = shalt.err (!%p962_p0)
}
  0x23   :  { %s1019_s1 = smov 128   ;;  %s1020_s17 = smov 8  }
  0x24   :  { %51 = dma.hbm_to_vmem [thread:$0]  %s1247_s3, 896, %s46_s11, [#allocation7], %s1019_s1, %s1019_s1, %s1020_s17  }
  0x25   :  { %s1021_s20 = smov [#allocation9]  }
  0x26   :  { %s57_s21 = sshll.u32 %s1021_s20, 4  ;;  %s58_s21 = int_to_ptr.vmem [resolvable:$true] %s57_s21 }
  0x27   :  { %s974_s22 = scalar_lea.vmem %s58_s21, 3072  ;;  %p979_p2 = scmp.lt.s32.totalorder %s58_s21, %s58_s21 }
  0x28   :  { %p975_p1 = scmp.ne.s32.totalorder %s58_s21, %s974_s22  ;;  %p980_p3 = scmp.lt.s32.totalorder %s974_s22, %s974_s22 }
  0x2a   :  { %p981_p4 = por %p980_p3, %p979_p2 }
  0x2c   :  { %p982_p5 = pnand %p981_p4, %p975_p1 }
  0x2e   :  { %985 = shalt.err (!%p982_p5)
}
  0x2f   :  { %63 = dma.hbm_to_vmem [thread:$0]  %s1248_s4, 3072, %s58_s21, [#allocation10], %s1019_s1, %s1019_s1, %s1020_s17  }
  0x30   :  { %1006 = dma.done.wait [#allocation4], 16  }
  0x31   :  { %1007 = vsyncadd [#allocation4], 4294967280 }
  0x32   :  { %1008 = dma.done.wait [#allocation7], 1408  }
  0x33   :  { %1009 = vsyncadd [#allocation7], 4294965888 }
  0x34   :  { %1010 = dma.done.wait [#allocation10], 3072  }
  0x35   :  { %1011 = vsyncadd [#allocation10], 4294964224  ;;  %v1022_v0 = vmov 0.0   ;;  %vm106_vm0 = vcmask 1043456   ;;  %v89_v1 = vld [vmem:[#allocation6 + $0x18] sm:$0xf]  ;;  %v92_v30 = vlaneseq }
  0x36   :  { %177 = vmatprep.mubr.f32.mxu0 %v1022_v0  ;;  %v88_v2 = vld [vmem:[#allocation6 + $0x10] sm:$0xf]  ;;  %v87_v3 = vld [vmem:[#allocation6 + $0x8] sm:$0xff]  ;;  %759 = vmatprep.subr.msk.mxu0 %vm106_vm0, %v89_v1  ;;  %v86_v4 = vld [vmem:[#allocation6] sm:$0xff]  ;;  %vm102_vm1 = vcmask 97280   ;;  %vm291_vm2 = vcmask 1040384  }
  0x37   :  { %v85_v5 = vld [vmem:[#allocation3] sm:$0x1]  ;;  %760 = vmatpush1.msk.msra.mxu0 %vm106_vm0, %v88_v2  ;;  %v850_v6 = vld [vmem:[#allocation9 + $0x74] ss:$8 sps:$4 sm:$0xff]   ;;  %v848_v7 = vld [vmem:[#allocation9 + $0x70] ss:$8 sps:$4 sm:$0xff]  }
  0x38   :  { %143 = vmatprep.subr.mxu0 %v87_v3  ;;  %814 = vmatprep.subr.bf16.mxu1 %v850_v6  ;;  %v853_v8 = vld [vmem:[#allocation9 + $0x64] ss:$8 sps:$4 sm:$0xff]   ;;  %v851_v9 = vld [vmem:[#allocation9 + $0x60] ss:$8 sps:$4 sm:$0xff]   ;;  %v856_v10 = vld [vmem:[#allocation9 + $0x54] ss:$8 sps:$4 sm:$0xff]  }
  0x39   :  { %144 = vmatpush1.msra.mxu0 %v86_v4  ;;  %826 = vmatpush1.bf16.msra.mxu1 %v848_v7  ;;  %v854_v11 = vld [vmem:[#allocation9 + $0x50] ss:$8 sps:$4 sm:$0xff]   ;;  %v859_v12 = vld [vmem:[#allocation9 + $0x44] ss:$8 sps:$4 sm:$0xff]   ;;  %v857_v13 = vld [vmem:[#allocation9 + $0x40] ss:$8 sps:$4 sm:$0xff]  }
  0x3a   :  { %761 = vmatmul.mubr.msk.f32.vlgmr.msra.gmra.mxu0 %vm102_vm1, %v85_v5  ;;  %498 = vmatprep.subr.bf16.mxu0 %v850_v6  ;;  %v860_v14 = vld [vmem:[#allocation9 + $0x30] ss:$8 sps:$4 sm:$0xff]   ;;  %v862_v15 = vld [vmem:[#allocation9 + $0x34] ss:$8 sps:$4 sm:$0xff]   ;;  %v865_v16 = vld [vmem:[#allocation9 + $0x24] ss:$8 sps:$4 sm:$0xff]  }
  0x3b   :  { %499 = vmatpush1.bf16.msra.mxu0 %v848_v7  ;;  %815 = vmatprep.subr.bf16.mxu1 %v853_v8  ;;  %v863_v17 = vld [vmem:[#allocation9 + $0x20] ss:$8 sps:$4 sm:$0xff]   ;;  %v868_v18 = vld [vmem:[#allocation9 + $0x14] ss:$8 sps:$4 sm:$0xff]   ;;  %v866_v19 = vld [vmem:[#allocation9 + $0x10] ss:$8 sps:$4 sm:$0xff]  }
  0x3c   :  { %500 = vmatprep.subr.bf16.mxu0 %v853_v8  ;;  %v871_v20 = vld [vmem:[#allocation9 + $0x4] ss:$8 sps:$4 sm:$0xff]   ;;  %v869_v21 = vld [vmem:[#allocation9] ss:$8 sps:$4 sm:$0xff]   ;;  %v874_v22 = vld [vmem:[#allocation9 + $0xb4] ss:$8 sps:$4 sm:$0xff]  }
  0x3d   :  { %827 = vmatpush1.bf16.msra.mxu1 %v851_v9  ;;  %v872_v23 = vld [vmem:[#allocation9 + $0xb0] ss:$8 sps:$4 sm:$0xff]   ;;  %v877_v24 = vld [vmem:[#allocation9 + $0xa4] ss:$8 sps:$4 sm:$0xff]   ;;  %v875_v25 = vld [vmem:[#allocation9 + $0xa0] ss:$8 sps:$4 sm:$0xff]  }
  0x3e   :  { %816 = vmatprep.subr.bf16.mxu1 %v856_v10  ;;  %v880_v26 = vld [vmem:[#allocation9 + $0x94] ss:$8 sps:$4 sm:$0xff]   ;;  %v878_v27 = vld [vmem:[#allocation9 + $0x90] ss:$8 sps:$4 sm:$0xff]   ;;  %v883_v28 = vld [vmem:[#allocation9 + $0x84] ss:$8 sps:$4 sm:$0xff]  }
  0x3f   :  { %501 = vmatpush1.bf16.msra.mxu0 %v851_v9  ;;  %v881_v29 = vld [vmem:[#allocation9 + $0x80] ss:$8 sps:$4 sm:$0xff]   ;;  %v93_v31 = vshrl.u32 %v92_v30, 7  ;;  %v90_v33 = vld [vmem:[%s1246_s2] sm:$0x3]  ;;  %v197_v48 = vld [vmem:[#allocation8 + $0x8] sm:$0xff] }
  0x40   :  { %502 = vmatprep.subr.bf16.mxu0 %v856_v10  ;;  %v196_v47 = vld [vmem:[#allocation8] sm:$0xff]  ;;  %v201_v50 = vld [vmem:[#allocation8 + $0x28] sm:$0xff]  ;;  %v202_v51 = vld [vmem:[#allocation8 + $0x30] sm:$0x11]  ;;  %v205_v54 = vunpack.c.l.bf16 %v197_v48  ;;  %v206_v63 = vunpack.c.h.bf16 %v197_v48  ;;  %vm292_vm3 = vsmask.f32 256 }
  0x41   :  { %828 = vmatpush1.bf16.msra.mxu1 %v854_v11  ;;  %v1081_v32 = vsub.s32 0, %v93_v31  ;;  %v1086_v34 = vsub.s32 1, %v93_v31  ;;  %v200_v49 = vld [vmem:[#allocation8 + $0x20] sm:$0xff]  ;;  %v198_v52 = vld [vmem:[#allocation8 + $0x10] sm:$0xff]  ;;  %v203_v53 = vunpack.c.l.bf16 %v196_v47  ;;  %v213_v57 = vunpack.c.l.bf16 %v201_v50  ;;  %v199_v60 = vld [vmem:[#allocation8 + $0x18] sm:$0xff] }
  0x42   :  { %817 = vmatprep.subr.bf16.mxu1 %v859_v12  ;;  %v211_v55 = vunpack.c.l.bf16 %v200_v49  ;;  %v215_v58 = vunpack.c.l.bf16 %v202_v51  ;;  %v204_v59 = vunpack.c.h.bf16 %v196_v47  ;;  %v207_v61 = vunpack.c.l.bf16 %v198_v52  ;;  %vm1093_vm7 = vmand %vm291_vm2, %vm292_vm3 }
  0x43   :  { %503 = vmatpush1.bf16.msra.mxu0 %v854_v11  ;;  %v95_v35 = vrot.slane %v90_v33, %v1081_v32  ;;  %v99_v36 = vrot.slane %v90_v33, %v1086_v34  ;;  %v212_v1 = vunpack.c.h.bf16 %v200_v49  ;;  %v214_v2 = vunpack.c.h.bf16 %v201_v50 }
  0x44   :  { %504 = vmatprep.subr.bf16.mxu0 %v859_v12  ;;  %vm294_vm4 = vcmask 520196   ;;  %vm295_vm5 = vsmask.f32 4352  ;;  %v216_v3 = vunpack.c.h.bf16 %v202_v51  ;;  %v208_v4 = vunpack.c.h.bf16 %v198_v52 }
  0x45   :  { %829 = vmatpush1.bf16.msra.mxu1 %v857_v13  ;;  %v209_v5 = vunpack.c.l.bf16 %v199_v60  ;;  %v210_v6 = vunpack.c.h.bf16 %v199_v60  ;;  %vm283_vm6 = vcmask 523268   ;;  %vm1098_vm8 = vmand %vm294_vm4, %vm295_vm5  ;;  %vm485_vm11 = vcmask 523264  }
  0x46   :  { %818 = vmatprep.subr.bf16.mxu1 %v862_v15  ;;  %vm1103_vm9 = vmor %vm283_vm6, %vm106_vm0 }
  0x47   :  { %505 = vmatpush1.bf16.msra.mxu0 %v857_v13  ;;  %vm297_vm10 = vmor %vm1098_vm8, %vm1093_vm7 }
  0x48   :  { %506 = vmatprep.subr.bf16.mxu0 %v862_v15 }
  0x49   :  { %830 = vmatpush1.bf16.msra.mxu1 %v860_v14 }
  0x4a   :  { %819 = vmatprep.subr.bf16.mxu1 %v865_v16 }
  0x4b   :  { %507 = vmatpush1.bf16.msra.mxu0 %v860_v14 }
  0x4c   :  { %508 = vmatprep.subr.bf16.mxu0 %v865_v16 }
  0x4d   :  { %831 = vmatpush1.bf16.msra.mxu1 %v863_v17 }
  0x4e   :  { %820 = vmatprep.subr.bf16.mxu1 %v868_v18 }
  0x4f   :  { %509 = vmatpush1.bf16.msra.mxu0 %v863_v17 }
  0x50   :  { %510 = vmatprep.subr.bf16.mxu0 %v868_v18 }
  0x51   :  { %832 = vmatpush1.bf16.msra.mxu1 %v866_v19 }
  0x52   :  { %821 = vmatprep.subr.bf16.mxu1 %v871_v20 }
  0x53   :  { %511 = vmatpush1.bf16.msra.mxu0 %v866_v19 }
  0x54   :  { %512 = vmatprep.subr.bf16.mxu0 %v871_v20 }
  0x55   :  { %833 = vmatpush1.bf16.msra.mxu1 %v869_v21 }
  0x56   :  { %822 = vmatprep.subr.bf16.mxu1 %v874_v22 }
  0x57   :  { %513 = vmatpush1.bf16.msra.mxu0 %v869_v21 }
  0x58   :  { %522 = vmatprep.subr.bf16.mxu0 %v874_v22 }
  0x59   :  { %834 = vmatpush2.bf16.msra.mxu1 %v872_v23 }
  0x5a   :  { %823 = vmatprep.subr.bf16.mxu1 %v877_v24 }
  0x5b   :  { %523 = vmatpush2.bf16.msra.mxu0 %v872_v23 }
  0x5c   :  { %524 = vmatprep.subr.bf16.mxu0 %v877_v24 }
  0x5d   :  { %835 = vmatpush2.bf16.msra.mxu1 %v875_v25 }
  0x5e   :  { %824 = vmatprep.subr.bf16.mxu1 %v880_v26 }
  0x5f   :  { %525 = vmatpush2.bf16.msra.mxu0 %v875_v25 }
  0x60   :  { %526 = vmatprep.subr.bf16.mxu0 %v880_v26 }
  0x61   :  { %836 = vmatpush2.bf16.msra.mxu1 %v878_v27 }
  0x62   :  { %825 = vmatprep.subr.bf16.mxu1 %v883_v28 }
  0x63   :  { %527 = vmatpush2.bf16.msra.mxu0 %v878_v27 }
  0x64   :  { %528 = vmatprep.subr.bf16.mxu0 %v883_v28 }
  0x65   :  { %837 = vmatpush2.bf16.msra.mxu1 %v881_v29 }
  0x67   :  { %529 = vmatpush2.bf16.msra.mxu0 %v881_v29  ;;  %v298_v29 = vld [vmem:[#allocation2 + $0x30] sm:$0x11] }
  0xfa   :  { %v179_v37 = vpop.f32.mrf.mxu0 }
  0xfb   :  { %v180_v38 = vadd.f32 %v179_v37, %v95_v35 }
  0xfc   :  { %v181_v39 = vpop.f32.mrf.mxu0 }
  0xfd   :  { %v762_v40 = vmul.f32 -1.442695, %v180_v38  ;;  %v182_v41 = vadd.f32 %v181_v39, %v99_v36 }
  0xff   :  { %894 = vpow2.f32 %v762_v40  ;;  %v763_v42 = vmul.f32 -1.442695, %v182_v41 }
 0x101   :  { %896 = vpow2.f32 %v763_v42 }
 0x10c   :  { %v895_v43 = vpop.eup %894 }
 0x10d   :  { %v190_v44 = vadd.f32 1.0, %v895_v43 }
 0x10e   :  { %v897_v45 = vpop.eup %896 }
 0x10f   :  { %898 = vrcp.f32 %v190_v44  ;;  %v191_v46 = vadd.f32 1.0, %v897_v45 }
 0x111   :  { %900 = vrcp.f32 %v191_v46 }
 0x11c   :  { %v899_v56 = vpop.eup %898 }
 0x11d   :  { %v220_v62 = vrot.slane %v899_v56, %v1081_v32 }
 0x11e   :  { %v901_v0 = vpop.eup %900 }
 0x11f   :  { %v225_v7 = vmul.f32 %v220_v62, %v203_v53  ;;  %v227_v8 = vmul.f32 %v220_v62, %v205_v54  ;;  %v224_v9 = vrot.slane %v901_v0, %v1081_v32  ;;  %v233_v11 = vmul.f32 %v220_v62, %v211_v55 }
 0x120   :  { %v235_v12 = vmul.f32 %v220_v62, %v213_v57  ;;  %v237_v13 = vmul.f32 %v220_v62, %v215_v58  ;;  %v229_v14 = vmul.f32 %v220_v62, %v207_v61  ;;  %v231_v23 = vmul.f32 %v220_v62, %v209_v5 }
 0x121   :  { %v226_v16 = vmul.f32 %v224_v9, %v204_v59  ;;  %v228_v17 = vmul.f32 %v224_v9, %v206_v63  ;;  %v234_v18 = vmul.f32 %v224_v9, %v212_v1  ;;  %v236_v19 = vmul.f32 %v224_v9, %v214_v2 }
 0x122   :  { %v238_v21 = vmul.f32 %v224_v9, %v216_v3  ;;  %v230_v22 = vmul.f32 %v224_v9, %v208_v4  ;;  %v232_v24 = vmul.f32 %v224_v9, %v210_v6 }
 0x123   :  { %v807_v25 = vpack.c.bf16 %v226_v16, %v225_v7  ;;  %v808_v26 = vpack.c.bf16 %v228_v17, %v227_v8  ;;  %v811_v27 = vpack.c.bf16 %v234_v18, %v233_v11  ;;  %v812_v28 = vpack.c.bf16 %v236_v19, %v235_v12 }
 0x124   :  { %v813_v30 = vpack.c.bf16 %v238_v21, %v237_v13  ;;  %v809_v31 = vpack.c.bf16 %v230_v22, %v229_v14  ;;  %v810_v33 = vpack.c.bf16 %v232_v24, %v231_v23 }
 0x125   :  { %285 = vst.msk [vmem:[#allocation2] sm:$0xff] %vm1103_vm9, %v807_v25  ;;  %286 = vst.msk [vmem:[#allocation2 + $0x8] sm:$0xff] %vm1103_vm9, %v808_v26 }
 0x126   :  { %289 = vst.msk [vmem:[#allocation2 + $0x20] sm:$0xff] %vm1103_vm9, %v811_v27  ;;  %290 = vst.msk [vmem:[#allocation2 + $0x28] sm:$0xff] %vm1103_vm9, %v812_v28  ;;  %v299_v35 = vsel %vm297_vm10, %v813_v30, %v298_v29 }
 0x127   :  { %287 = vst.msk [vmem:[#allocation2 + $0x10] sm:$0xff] %vm1103_vm9, %v809_v31  ;;  %288 = vst.msk [vmem:[#allocation2 + $0x18] sm:$0xff] %vm1103_vm9, %v810_v33 }
 0x128   :  { %300 = vst [vmem:[#allocation2 + $0x30] sm:$0x11] %v299_v35 }
 0x12c   :  { %v301_v36 = vld [vmem:[#allocation2] sm:$0xff]  ;;  %v302_v37 = vld [vmem:[#allocation2 + $0x8] sm:$0xff] }
 0x12d   :  { %v884_v38 = vld [vmem:[#allocation2 + $0x4] ss:$8 sps:$4 sm:$0xff]   ;;  %v771_v40 = vcombine.low %v301_v36, %v302_v37  ;;  %v891_v44 = vld [vmem:[#allocation2 + $0x20] ss:$8 sps:$4 sm:$0xff]  }
 0x12e   :  { %v886_v39 = vld [vmem:[#allocation2 + $0x10] ss:$8 sps:$4 sm:$0xff]   ;;  %803 = vmatprep.mubr.msk.bf16.mxu0 %vm485_vm11, %v884_v38  ;;  %v888_v41 = vld [vmem:[#allocation2 + $0x14] ss:$8 sps:$4 sm:$0xff]   ;;  %v889_v42 = vld [vmem:[#allocation2 + $0x24] ss:$8 sps:$4 sm:$0xff]  }
 0x12f   :  { %531 = vmatmul.mubr.bf16.vlgmr.msra.gmra.mxu0 %v771_v40  ;;  %804 = vmatprep.mubr.msk.bf16.mxu1 %vm485_vm11, %v888_v41  ;;  %v307_v43 = vld [vmem:[#allocation2 + $0x30] sm:$0x11] }
 0x130   :  { %541 = vmatmul.mubr.bf16.vlgmr.msra.gmra.mxu1 %v886_v39  ;;  %v778_v45 = vcombine.high %v307_v43, %v307_v43  ;;  %v777_v46 = vcombine.low %v307_v43, %v307_v43 }
 0x131   :  { %805 = vmatprep.mubr.msk.bf16.mxu1 %vm485_vm11, %v889_v42 }
 0x138   :  { %551 = vmatmul.mubr.bf16.gmra.mxu1 %v891_v44 }
 0x139   :  { %806 = vmatprep.mubr.msk.bf16.mxu1 %vm485_vm11, %v778_v45 }
 0x140   :  { %561 = vmatmul.mubr.bf16.gmra.mxu1 %v777_v46 }
 0x1ef   :  { %v1127_v47 = vpop.f32.mrf.mxu0 }
 0x1f0   :  { %v1129_v48 = vpop.f32.mrf.mxu1  ;;  %v598_v52 = vmul.f32 %v1127_v47, %v1127_v47 }
 0x1f1   :  { %v1131_v49 = vpop.f32.mrf.mxu0  ;;  %v602_v57 = vmul.f32 %v1129_v48, %v1129_v48 }
 0x1f2   :  { %v1133_v50 = vpop.f32.mrf.mxu1  ;;  %v599_v61 = vmul.f32 %v1131_v49, %v1131_v49 }
 0x1f3   :  { %v1135_v51 = vpop.f32.mrf.mxu0  ;;  %v603_v2 = vmul.f32 %v1133_v50, %v1133_v50 }
 0x1f4   :  { %v569_v53 = vadd.f32 %v1135_v51, %v1127_v47  ;;  %v600_v54 = vmul.f32 %v1135_v51, %v1135_v51  ;;  %v1143_v55 = vpop.f32.mrf.mxu1 }
 0x1f5   :  { %v1145_v56 = vpop.f32.mrf.mxu0  ;;  %v604_v4 = vmul.f32 %v1143_v55, %v1143_v55 }
 0x1f6   :  { %v612_v58 = vadd.f32 %v600_v54, %v598_v52  ;;  %v570_v59 = vadd.f32 %v569_v53, %v1129_v48  ;;  %v583_v60 = vadd.f32 %v1145_v56, %v1131_v49  ;;  %v601_v62 = vmul.f32 %v1145_v56, %v1145_v56  ;;  %v1156_v63 = vpop.f32.mrf.mxu1 }
 0x1f7   :  { %v605_v10 = vmul.f32 %v1156_v63, %v1156_v63 }
 0x1f8   :  { %v613_v0 = vadd.f32 %v612_v58, %v602_v57  ;;  %v584_v1 = vadd.f32 %v583_v60, %v1133_v50  ;;  %v571_v3 = vadd.f32 %v570_v59, %v1143_v55  ;;  %v625_v5 = vadd.f32 %v601_v62, %v599_v61  ;;  %v1164_v6 = vpop.f32.mrf.mxu1 }
 0x1f9   :  { %v606_v14 = vmul.f32 %v1164_v6, %v1164_v6 }
 0x1fa   :  { %v614_v7 = vadd.f32 %v613_v0, %v604_v4  ;;  %v626_v8 = vadd.f32 %v625_v5, %v603_v2  ;;  %v585_v9 = vadd.f32 %v584_v1, %v1156_v63  ;;  %v1169_v11 = vpop.f32.mrf.mxu1  ;;  %v572_v13 = vadd.f32 %v571_v3, %v1164_v6 }
 0x1fb   :  { %v607_v18 = vmul.f32 %v1169_v11, %v1169_v11 }
 0x1fc   :  { %v627_v12 = vadd.f32 %v626_v8, %v605_v10  ;;  %v1174_v15 = vpop.f32.mrf.mxu1  ;;  %v615_v16 = vadd.f32 %v614_v7, %v606_v14  ;;  %v586_v17 = vadd.f32 %v585_v9, %v1169_v11 }
 0x1fd   :  { %v608_v19 = vmul.f32 %v1174_v15, %v1174_v15  ;;  %v573_v22 = vadd.f32 %v572_v13, %v1174_v15 }
 0x1fe   :  { %v1181_v20 = vpop.f32.mrf.mxu1  ;;  %v628_v21 = vadd.f32 %v627_v12, %v607_v18 }
 0x1ff   :  { %v609_v23 = vmul.f32 %v1181_v20, %v1181_v20  ;;  %v616_v27 = vadd.f32 %v615_v16, %v608_v19  ;;  %v587_v28 = vadd.f32 %v586_v17, %v1181_v20 }
 0x200   :  { %v1186_v24 = vpop.f32.mrf.mxu1 }
 0x201   :  { %v575_v25 = vsel %vm291_vm2, %v1186_v24, 0.0  ;;  %v610_v26 = vmul.f32 %v1186_v24, %v1186_v24  ;;  %v629_v36 = vadd.f32 %v628_v21, %v609_v23 }
 0x202   :  { %v576_v29 = vadd.f32 %v575_v25, %v573_v22  ;;  %v1193_v30 = vpop.f32.mrf.mxu1 }
 0x203   :  { %v617_v31 = vsel %vm291_vm2, %v610_v26, 0.0  ;;  %v588_v33 = vsel %vm291_vm2, %v1193_v30, 0.0  ;;  %v611_v35 = vmul.f32 %v1193_v30, %v1193_v30 }
 0x204   :  { %v577_v37 = vrot.slane %v576_v29, 4  ;;  %v618_v38 = vadd.f32 %v617_v31, %v616_v27  ;;  %v589_v39 = vadd.f32 %v588_v33, %v587_v28  ;;  %v566_v40 = vpop.f32.mrf.mxu1  ;;  %v650_v28 = vld [vmem:[%s1249_s5] sm:$0x3]  ;;  %s1023_s5 = smov [#allocation11]  }
 0x205   :  { %v630_v41 = vsel %vm291_vm2, %v611_v35, 0.0  ;;  %v700_v31 = vld [vmem:[%s1250_s6] sm:$0x3]  ;;  %v659_v35 = vrot.slane %v650_v28, %v1086_v34  ;;  %s745_s6 = sshll.u32 %s1023_s5, 4  ;;  %s746_s6 = int_to_ptr.vmem [resolvable:$true] %s745_s6 }
 0x206   :  { %v578_v42 = vadd.f32 %v577_v37, %v576_v29  ;;  %v619_v43 = vrot.slane %v618_v38, 4  ;;  %v590_v44 = vrot.slane %v589_v39, 4  ;;  %v631_v45 = vadd.f32 %v630_v41, %v629_v36  ;;  %v567_v46 = vpop.f32.mrf.mxu1  ;;  %s986_s29 = scalar_lea.vmem %s746_s6, 1792  ;;  %p991_p7 = scmp.lt.s32.totalorder %s746_s6, %s746_s6 }
 0x207   :  { %v655_v29 = vrot.slane %v650_v28, %v1081_v32  ;;  %v705_v36 = vrot.slane %v700_v31, %v1081_v32  ;;  %v709_v37 = vrot.slane %v700_v31, %v1086_v34  ;;  %p987_p6 = scmp.ne.s32.totalorder %s746_s6, %s986_s29  ;;  %p992_p8 = scmp.lt.s32.totalorder %s986_s29, %s986_s29 }
 0x208   :  { %v579_v52 = vrot.slane %v578_v42, 2  ;;  %v620_v53 = vadd.f32 %v619_v43, %v618_v38  ;;  %v591_v54 = vadd.f32 %v590_v44, %v589_v39  ;;  %v632_v57 = vrot.slane %v631_v45, 4 }
 0x209   :  { %p993_p9 = por %p992_p8, %p991_p7 }
 0x20a   :  { %v580_v58 = vadd.f32 %v579_v52, %v578_v42  ;;  %v621_v59 = vrot.slane %v620_v53, 2  ;;  %v592_v60 = vrot.slane %v591_v54, 2  ;;  %v633_v61 = vadd.f32 %v632_v57, %v631_v45 }
 0x20b   :  { %p994_p10 = pnand %p993_p9, %p987_p6 }
 0x20c   :  { %v581_v62 = vrot.slane %v580_v58, 1  ;;  %v622_v0 = vadd.f32 %v621_v59, %v620_v53  ;;  %v593_v1 = vadd.f32 %v592_v60, %v591_v54  ;;  %v634_v2 = vrot.slane %v633_v61, 2 }
 0x20e   :  { %v582_v3 = vadd.f32 %v581_v62, %v580_v58  ;;  %v623_v4 = vrot.slane %v622_v0, 1  ;;  %v594_v5 = vrot.slane %v593_v1, 1  ;;  %v635_v7 = vadd.f32 %v634_v2, %v633_v61 }
 0x210   :  { %v596_v8 = vmul.f32 0.020408163, %v582_v3  ;;  %v624_v9 = vadd.f32 %v623_v4, %v622_v0  ;;  %v595_v10 = vadd.f32 %v594_v5, %v593_v1  ;;  %v636_v12 = vrot.slane %v635_v7, 1 }
 0x212   :  { %v638_v13 = vmul.f32 0.020408163, %v624_v9  ;;  %v640_v14 = vmul.f32 %v596_v8, %v596_v8  ;;  %v1201_v17 = vmul.f32 0.020408163, %v595_v10  ;;  %v637_v18 = vadd.f32 %v636_v12, %v635_v7 }
 0x213   :  { %v664_v39 = vsub.f32 %v1127_v47, %v596_v8  ;;  %v666_v40 = vsub.f32 %v1135_v51, %v596_v8  ;;  %v668_v41 = vsub.f32 %v1129_v48, %v596_v8  ;;  %v670_v42 = vsub.f32 %v1143_v55, %v596_v8 }
 0x214   :  { %v642_v16 = vsub.f32 %v638_v13, %v640_v14  ;;  %v639_v21 = vmul.f32 0.020408163, %v637_v18  ;;  %v641_v22 = vmul.f32 %v1201_v17, %v1201_v17  ;;  %v672_v43 = vsub.f32 %v1164_v6, %v596_v8 }
 0x215   :  { %v674_v44 = vsub.f32 %v1174_v15, %v596_v8  ;;  %v676_v45 = vsub.f32 %v1186_v24, %v596_v8  ;;  %v665_v34 = vsub.f32 %v1131_v49, %v1201_v17  ;;  %v667_v47 = vsub.f32 %v1145_v56, %v1201_v17 }
 0x216   :  { %v644_v19 = vmax.f32 %v642_v16, 0.0  ;;  %v643_v25 = vsub.f32 %v639_v21, %v641_v22  ;;  %v669_v48 = vsub.f32 %v1133_v50, %v1201_v17  ;;  %v671_v51 = vsub.f32 %v1156_v63, %v1201_v17 }
 0x217   :  { %v673_v63 = vsub.f32 %v1169_v11, %v1201_v17  ;;  %v675_v1 = vsub.f32 %v1181_v20, %v1201_v17  ;;  %v677_v2 = vsub.f32 %v1193_v30, %v1201_v17 }
 0x218   :  { %v646_v23 = vadd.f32 0.001, %v644_v19  ;;  %v645_v26 = vmax.f32 %v643_v25, 0.0 }
 0x21a   :  { %902 = vrsqrt.f32 %v646_v23  ;;  %v647_v27 = vadd.f32 0.001, %v645_v26 }
 0x21c   :  { %904 = vrsqrt.f32 %v647_v27 }
 0x227   :  { %v903_v33 = vpop.eup %902 }
 0x228   :  { %v662_v38 = vmul.f32 %v903_v33, %v655_v29 }
 0x229   :  { %v905_v52 = vpop.eup %904 }
 0x22a   :  { %v681_v46 = vrot.slane %v662_v38, %v1081_v32  ;;  %v663_v58 = vmul.f32 %v905_v52, %v659_v35 }
 0x22c   :  { %v686_v55 = vmul.f32 %v681_v46, %v664_v39  ;;  %v688_v6 = vmul.f32 %v681_v46, %v666_v40  ;;  %v690_v15 = vmul.f32 %v681_v46, %v668_v41  ;;  %v692_v53 = vmul.f32 %v681_v46, %v670_v42 }
 0x22d   :  { %v694_v24 = vmul.f32 %v681_v46, %v672_v43  ;;  %v696_v54 = vmul.f32 %v681_v46, %v674_v44  ;;  %v698_v57 = vmul.f32 %v681_v46, %v676_v45  ;;  %v685_v50 = vrot.slane %v663_v58, %v1081_v32 }
 0x22e   :  { %v712_v59 = vadd.f32 %v705_v36, %v686_v55  ;;  %v714_v60 = vadd.f32 %v705_v36, %v688_v6  ;;  %v716_v49 = vadd.f32 %v705_v36, %v690_v15  ;;  %v718_v61 = vadd.f32 %v705_v36, %v692_v53 }
 0x22f   :  { %v720_v62 = vadd.f32 %v705_v36, %v694_v24  ;;  %v722_v56 = vadd.f32 %v705_v36, %v696_v54  ;;  %v724_v0 = vadd.f32 %v705_v36, %v698_v57  ;;  %v687_v3 = vmul.f32 %v685_v50, %v665_v34 }
 0x230   :  { %726 = vst [vmem:[#allocation11] sm:$0xff] %v712_v59  ;;  %728 = vst [vmem:[#allocation11 + $0x10] sm:$0xff] %v714_v60  ;;  %v689_v4 = vmul.f32 %v685_v50, %v667_v47  ;;  %v691_v5 = vmul.f32 %v685_v50, %v669_v48  ;;  %v693_v32 = vmul.f32 %v685_v50, %v671_v51 }
 0x231   :  { %730 = vst [vmem:[#allocation11 + $0x20] sm:$0xff] %v716_v49  ;;  %732 = vst [vmem:[#allocation11 + $0x30] sm:$0xff] %v718_v61  ;;  %v695_v7 = vmul.f32 %v685_v50, %v673_v63  ;;  %v697_v8 = vmul.f32 %v685_v50, %v675_v1  ;;  %v699_v9 = vmul.f32 %v685_v50, %v677_v2 }
 0x232   :  { %734 = vst [vmem:[#allocation11 + $0x40] sm:$0xff] %v720_v62  ;;  %736 = vst [vmem:[#allocation11 + $0x50] sm:$0xff] %v722_v56  ;;  %v713_v10 = vadd.f32 %v709_v37, %v687_v3  ;;  %v715_v11 = vadd.f32 %v709_v37, %v689_v4  ;;  %v717_v12 = vadd.f32 %v709_v37, %v691_v5 }
 0x233   :  { %738 = vst [vmem:[#allocation11 + $0x60] sm:$0x1] %v724_v0  ;;  %v719_v13 = vadd.f32 %v709_v37, %v693_v32  ;;  %v721_v20 = vadd.f32 %v709_v37, %v695_v7  ;;  %v723_v14 = vadd.f32 %v709_v37, %v697_v8  ;;  %v725_v16 = vadd.f32 %v709_v37, %v699_v9 }
 0x234   :  { %727 = vst [vmem:[#allocation11 + $0x8] sm:$0xff] %v713_v10  ;;  %729 = vst [vmem:[#allocation11 + $0x18] sm:$0xff] %v715_v11 }
 0x235   :  { %731 = vst [vmem:[#allocation11 + $0x28] sm:$0xff] %v717_v12  ;;  %733 = vst [vmem:[#allocation11 + $0x38] sm:$0xff] %v719_v13 }
 0x236   :  { %735 = vst [vmem:[#allocation11 + $0x48] sm:$0xff] %v721_v20  ;;  %737 = vst [vmem:[#allocation11 + $0x58] sm:$0xff] %v723_v14 }
 0x237   :  { %739 = vst [vmem:[#allocation11 + $0x68] sm:$0x1] %v725_v16 }
 0x238   :  { %997 = shalt.err (!%p994_p10)
}
 0x239   :  { %751 = dma.vmem_to_hbm [thread:$0]  %s746_s6, 1792, %s1251_s7, [#allocation5], %s1015_s27, %s1015_s27, %s1016_s28  }
 0x23a   :  { %1012 = dma.done.wait [#allocation5], 1792  }
 0x23b   :  { %1013 = vsyncadd [#allocation5], 4294965504 }
 0x23c   :  { %755 = vsyncpa [#allocation4], 1 }
 0x23d   :  { %756 = vsyncpa [#allocation7], 1 }
 0x23e   :  { %757 = vsyncpa [#allocation10], 1 }
 0x23f   :  { %758 = vsyncpa [#allocation5], 1 }

</bundles_post_ra>
